<compile_context>
chip_gen: v7x
topology: tpu7x:2x2x1
jax: 0.10.0
libtpu: 0.0.40
codegen_flags: <defaults>
</compile_context>

<pallas_src>
import math
from functools import lru_cache

import numpy as np
import jax
import jax.numpy as jnp
from jax.experimental import pallas as pl
from jax.experimental.pallas import tpu as pltpu


# ----------------------------------------------------------------------------
# Deterministic wavelet filters (db2), hardcoded instead of pywt.Wavelet(...)
# ----------------------------------------------------------------------------
_DB2_DEC_LO = [-0.12940952255092145, 0.22414386804185735,
               0.836516303737469, 0.48296291314469025]
_DB2_DEC_HI = [-0.48296291314469025, 0.836516303737469,
               -0.22414386804185735, -0.12940952255092145]


def build_idwt_matrices(input_height, input_width,
                        dec_lo=_DB2_DEC_LO, dec_hi=_DB2_DEC_HI):
    """Mirrors IDWT_2D.get_matrix() exactly (numpy, deterministic)."""
    band_low = list(dec_lo)[::-1]
    band_high = list(dec_hi)[::-1]
    assert len(band_low) == len(band_high)
    band_length = len(band_low)
    assert band_length % 2 == 0
    band_length_half = math.floor(band_length / 2)

    L1 = int(np.max((input_height, input_width)))
    L = math.floor(L1 / 2)
    matrix_h = np.zeros((L, L1 + band_length - 2))
    matrix_g = np.zeros((L1 - L, L1 + band_length - 2))
    end = None if band_length_half == 1 else -band_length_half + 1

    index = 0
    for i in range(L):
        for j in range(band_length):
            matrix_h[i, index + j] = band_low[j]
        index += 2
    matrix_h_0 = matrix_h[0:math.floor(input_height / 2),
                          0:input_height + band_length - 2]
    matrix_h_1 = matrix_h[0:math.floor(input_width / 2),
                          0:input_width + band_length - 2]

    index = 0
    for i in range(L1 - L):
        for j in range(band_length):
            matrix_g[i, index + j] = band_high[j]
        index += 2
    matrix_g_0 = matrix_g[0:input_height - math.floor(input_height / 2),
                          0:input_height + band_length - 2]
    matrix_g_1 = matrix_g[0:input_width - math.floor(input_width / 2),
                          0:input_width + band_length - 2]

    matrix_h_0 = matrix_h_0[:, band_length_half - 1:end]          # (H/2, H)
    matrix_h_1 = matrix_h_1[:, band_length_half - 1:end]
    matrix_h_1 = np.transpose(matrix_h_1)                          # (W, W/2)
    matrix_g_0 = matrix_g_0[:, band_length_half - 1:end]          # (H/2, H)
    matrix_g_1 = matrix_g_1[:, band_length_half - 1:end]
    matrix_g_1 = np.transpose(matrix_g_1)                          # (W, W/2)

    return (matrix_h_0.astype(np.float32), matrix_h_1.astype(np.float32),
            matrix_g_0.astype(np.float32), matrix_g_1.astype(np.float32))


@lru_cache(maxsize=None)
def _get_idwt_matrices_dev(H, W):
    """Cached, pre-transposed filter matrices as device arrays (hoisted glue)."""
    m_l0, m_l1, m_h0, m_h1 = build_idwt_matrices(H, W)
    l0t = jnp.asarray(m_l0.T)   # (H, H/2)
    h0t = jnp.asarray(m_h0.T)   # (H, H/2)
    l1t = jnp.asarray(m_l1.T)   # (W/2, W)
    h1t = jnp.asarray(m_h1.T)   # (W/2, W)
    return l0t, h0t, l1t, h1t


# ----------------------------------------------------------------------------
# Pallas kernel.  Per grid step it reconstructs TB full planes:
#   L    = LL @ L1^T + LH @ H1^T        (batch folded into matmul M dim)
#   Hrow = HL @ L1^T + HH @ H1^T
#   out  = L0^T @ L + H0^T @ Hrow       (batched dot_general over the TB planes)
# ----------------------------------------------------------------------------
def _idwt2d_kernel(ll_ref, lh_ref, hl_ref, hh_ref,
                   l0t_ref, h0t_ref, l1t_ref, h1t_ref, out_ref):
    TB, H2, W2 = ll_ref.shape
    H = out_ref.shape[1]
    W = out_ref.shape[2]

    # Fold the TB planes into the M dimension of the row-reconstruction matmuls.
    ll = ll_ref[...].reshape(TB * H2, W2)
    lh = lh_ref[...].reshape(TB * H2, W2)
    hl = hl_ref[...].reshape(TB * H2, W2)
    hh = hh_ref[...].reshape(TB * H2, W2)

    l1t = l1t_ref[...]          # (W/2, W)
    h1t = h1t_ref[...]          # (W/2, W)

    # Row (width) reconstruction: (TB*H/2, W/2) @ (W/2, W).
    L = (jnp.dot(ll, l1t, preferred_element_type=jnp.float32) +
         jnp.dot(lh, h1t, preferred_element_type=jnp.float32))     # (TB*H/2, W)
    Hrow = (jnp.dot(hl, l1t, preferred_element_type=jnp.float32) +
            jnp.dot(hh, h1t, preferred_element_type=jnp.float32))  # (TB*H/2, W)

    L = L.reshape(TB, H2, W)
    Hrow = Hrow.reshape(TB, H2, W)

    # Column (height) reconstruction as a batched matmul over the TB planes.
    # (Broadcast of the small (H, H/2) filter over the batch dim; hoisted once.)
    l0t_b = jnp.broadcast_to(l0t_ref[...], (TB, H, H2))
    h0t_b = jnp.broadcast_to(h0t_ref[...], (TB, H, H2))
    out = (jnp.einsum('bhi,biw->bhw', l0t_b, L,
                      preferred_element_type=jnp.float32) +
           jnp.einsum('bhi,biw->bhw', h0t_b, Hrow,
                      preferred_element_type=jnp.float32))          # (TB, H, W)

    # Note: for W < 128 this is a masked (sub-lane-width) store; flattening the
    # output block to (TB, H*W) would make it lane-dense but relies on a
    # minor-dim reshape inside the kernel, which we avoid for lowering safety.
    out_ref[...] = out.astype(out_ref.dtype)


def _choose_tb(B, H, W, budget_bytes=24 * 1024 * 1024):
    """Largest TB (dividing B) that fits a conservative VMEM budget and keeps
    at least 2 grid steps so both v7x TensorCores get work."""
    # rough per-plane VMEM: 4 subbands + output + intermediates + broadcasts,
    # with headroom for double-buffering of the pipelined streams.
    per_plane = 32 * H * W + 4 * H * H + 1
    cap = max(1, budget_bytes // per_plane)
    if B >= 2:
        cap = min(cap, B // 2)      # grid length >= 2  (v7x megacore)
    cap = min(cap, B)
    tb = 1
    for d in range(1, cap + 1):
        if B % d == 0:
            tb = d
    return tb


def idwt_2d(LL, LH, HL, HH):
    """2D inverse DWT matching IDWT_2D.forward (db2 wavelet)."""
    assert LL.ndim == LH.ndim == HL.ndim == HH.ndim == 4
    N, C, H2, W2 = LL.shape
    H = LL.shape[-2] + HH.shape[-2]
    W = LL.shape[-1] + HH.shape[-1]
    assert H == 2 * H2 and W == 2 * W2, "IDWT_2D assumes even H and W"

    l0t, h0t, l1t, h1t = _get_idwt_matrices_dev(H, W)

    B = N * C
    ll = LL.reshape(B, H2, W2)
    lh = LH.reshape(B, H2, W2)
    hl = HL.reshape(B, H2, W2)
    hh = HH.reshape(B, H2, W2)

    TB = _choose_tb(B, H, W)
    grid = (B // TB,)

    band_spec = pl.BlockSpec((TB, H2, W2), lambda b: (b, 0, 0))
    mat0_spec = pl.BlockSpec((H, H2), lambda b: (0, 0))
    mat1_spec = pl.BlockSpec((W2, W), lambda b: (0, 0))

    out = pl.pallas_call(
        _idwt2d_kernel,
        out_shape=jax.ShapeDtypeStruct((B, H, W), LL.dtype),
        grid_spec=pltpu.PrefetchScalarGridSpec(
            num_scalar_prefetch=0,
            grid=grid,
            in_specs=[band_spec, band_spec, band_spec, band_spec,
                      mat0_spec, mat0_spec, mat1_spec, mat1_spec],
            out_specs=pl.BlockSpec((TB, H, W), lambda b: (b, 0, 0)),
        ),
        compiler_params=pltpu.CompilerParams(
            dimension_semantics=("parallel",),
            vmem_limit_bytes=48 * 1024 * 1024),
    )(ll, lh, hl, hh, l0t, h0t, l1t, h1t)

    return out.reshape(N, C, H, W)


def idwt_2d_reference(LL, LH, HL, HH):
    """Pure-JAX reference (same math as IDWTFunction_2D.forward)."""
    H = LL.shape[-2] + HH.shape[-2]
    W = LL.shape[-1] + HH.shape[-1]
    m_l0, m_l1, m_h0, m_h1 = build_idwt_matrices(H, W)
    l0, l1 = jnp.asarray(m_l0), jnp.asarray(m_l1)
    h0, h1 = jnp.asarray(m_h0), jnp.asarray(m_h1)
    L = jnp.matmul(LL, l1.T) + jnp.matmul(LH, h1.T)
    Hc = jnp.matmul(HL, l1.T) + jnp.matmul(HH, h1.T)
    return jnp.matmul(l0.T, L) + jnp.matmul(h0.T, Hc)


if __name__ == "__main__":
    key = jax.random.PRNGKey(0)
    k1, k2, k3, k4 = jax.random.split(key, 4)
    N, C, H, W = 2, 4, 16, 16
    LL = jax.random.normal(k1, (N, C, H // 2, W // 2), dtype=jnp.float32)
    LH = jax.random.normal(k2, (N, C, H // 2, W // 2), dtype=jnp.float32)
    HL = jax.random.normal(k3, (N, C, H // 2, W // 2), dtype=jnp.float32)
    HH = jax.random.normal(k4, (N, C, H // 2, W // 2), dtype=jnp.float32)

    out = idwt_2d(LL, LH, HL, HH)
    out = jax.block_until_ready(out)

    ref = idwt_2d_reference(LL, LH, HL, HH)
    assert out.shape == (N, C, H, W)
    assert jnp.allclose(out, ref, atol=1e-5, rtol=1e-5)

    print("KERNEL_OK")
</pallas_src>

<mosaic_0001>
module attributes {stable_mosaic.version = 11 : i64} {
  func.func @_idwt2d_kernel(%arg0: i32, %arg1: memref<4x8x8xf32, #tpu.memory_space<vmem>>, %arg2: memref<4x8x8xf32, #tpu.memory_space<vmem>>, %arg3: memref<4x8x8xf32, #tpu.memory_space<vmem>>, %arg4: memref<4x8x8xf32, #tpu.memory_space<vmem>>, %arg5: memref<16x8xf32, #tpu.memory_space<vmem>>, %arg6: memref<16x8xf32, #tpu.memory_space<vmem>>, %arg7: memref<8x16xf32, #tpu.memory_space<vmem>>, %arg8: memref<8x16xf32, #tpu.memory_space<vmem>>, %arg9: memref<4x16x16xf32, #tpu.memory_space<vmem>>) attributes {dimension_semantics = [#tpu.dimension_semantics<parallel>], iteration_bounds = array<i64: 2>, scalar_prefetch = 0 : i64, scratch_operands = 0 : i64, tpu.core_type = #tpu.core_type<tc>, window_params = [{transform_indices = @transform_0, window_bounds = array<i64: 4, 8, 8>}, {transform_indices = @transform_1, window_bounds = array<i64: 4, 8, 8>}, {transform_indices = @transform_2, window_bounds = array<i64: 4, 8, 8>}, {transform_indices = @transform_3, window_bounds = array<i64: 4, 8, 8>}, {pipeline_mode = #tpu.pipeline_mode<synchronous>, transform_indices = @transform_4, window_bounds = array<i64: 16, 8>}, {pipeline_mode = #tpu.pipeline_mode<synchronous>, transform_indices = @transform_5, window_bounds = array<i64: 16, 8>}, {pipeline_mode = #tpu.pipeline_mode<synchronous>, transform_indices = @transform_6, window_bounds = array<i64: 8, 16>}, {pipeline_mode = #tpu.pipeline_mode<synchronous>, transform_indices = @transform_7, window_bounds = array<i64: 8, 16>}, {transform_indices = @transform_8, window_bounds = array<i64: 4, 16, 16>}]} {
    %c0 = arith.constant 0 : index
    %c0_0 = arith.constant 0 : index
    %c0_1 = arith.constant 0 : index
    %0 = vector.load %arg1[%c0, %c0_0, %c0_1] : memref<4x8x8xf32, #tpu.memory_space<vmem>>, vector<4x8x8xf32>
    %1 = vector.shape_cast %0 : vector<4x8x8xf32> to vector<32x8xf32>
    %c0_2 = arith.constant 0 : index
    %c0_3 = arith.constant 0 : index
    %c0_4 = arith.constant 0 : index
    %2 = vector.load %arg2[%c0_2, %c0_3, %c0_4] : memref<4x8x8xf32, #tpu.memory_space<vmem>>, vector<4x8x8xf32>
    %3 = vector.shape_cast %2 : vector<4x8x8xf32> to vector<32x8xf32>
    %c0_5 = arith.constant 0 : index
    %c0_6 = arith.constant 0 : index
    %c0_7 = arith.constant 0 : index
    %4 = vector.load %arg3[%c0_5, %c0_6, %c0_7] : memref<4x8x8xf32, #tpu.memory_space<vmem>>, vector<4x8x8xf32>
    %5 = vector.shape_cast %4 : vector<4x8x8xf32> to vector<32x8xf32>
    %c0_8 = arith.constant 0 : index
    %c0_9 = arith.constant 0 : index
    %c0_10 = arith.constant 0 : index
    %6 = vector.load %arg4[%c0_8, %c0_9, %c0_10] : memref<4x8x8xf32, #tpu.memory_space<vmem>>, vector<4x8x8xf32>
    %7 = vector.shape_cast %6 : vector<4x8x8xf32> to vector<32x8xf32>
    %c0_11 = arith.constant 0 : index
    %c0_12 = arith.constant 0 : index
    %8 = vector.load %arg7[%c0_11, %c0_12] : memref<8x16xf32, #tpu.memory_space<vmem>>, vector<8x16xf32>
    %c0_13 = arith.constant 0 : index
    %c0_14 = arith.constant 0 : index
    %9 = vector.load %arg8[%c0_13, %c0_14] : memref<8x16xf32, #tpu.memory_space<vmem>>, vector<8x16xf32>
    %cst = arith.constant dense<0.000000e+00> : vector<32x16xf32>
    %10 = tpu.matmul %1, %8, %cst {dimension_numbers = #tpu.dot_dimension_numbers<[1], [0], [0], [1], [0, 0, 1, 1], [], []>} : vector<32x8xf32>, vector<8x16xf32>, vector<32x16xf32> -> vector<32x16xf32>
    %cst_15 = arith.constant dense<0.000000e+00> : vector<32x16xf32>
    %11 = tpu.matmul %3, %9, %cst_15 {dimension_numbers = #tpu.dot_dimension_numbers<[1], [0], [0], [1], [0, 0, 1, 1], [], []>} : vector<32x8xf32>, vector<8x16xf32>, vector<32x16xf32> -> vector<32x16xf32>
    %12 = arith.addf %10, %11 : vector<32x16xf32>
    %cst_16 = arith.constant dense<0.000000e+00> : vector<32x16xf32>
    %13 = tpu.matmul %5, %8, %cst_16 {dimension_numbers = #tpu.dot_dimension_numbers<[1], [0], [0], [1], [0, 0, 1, 1], [], []>} : vector<32x8xf32>, vector<8x16xf32>, vector<32x16xf32> -> vector<32x16xf32>
    %cst_17 = arith.constant dense<0.000000e+00> : vector<32x16xf32>
    %14 = tpu.matmul %7, %9, %cst_17 {dimension_numbers = #tpu.dot_dimension_numbers<[1], [0], [0], [1], [0, 0, 1, 1], [], []>} : vector<32x8xf32>, vector<8x16xf32>, vector<32x16xf32> -> vector<32x16xf32>
    %15 = arith.addf %13, %14 : vector<32x16xf32>
    %16 = vector.shape_cast %12 : vector<32x16xf32> to vector<4x8x16xf32>
    %17 = vector.shape_cast %15 : vector<32x16xf32> to vector<4x8x16xf32>
    %c0_18 = arith.constant 0 : index
    %c0_19 = arith.constant 0 : index
    %18 = vector.load %arg5[%c0_18, %c0_19] : memref<16x8xf32, #tpu.memory_space<vmem>>, vector<16x8xf32>
    %19 = vector.shape_cast %18 : vector<16x8xf32> to vector<1x16x8xf32>
    %20 = vector.broadcast %19 : vector<1x16x8xf32> to vector<4x16x8xf32>
    %c0_20 = arith.constant 0 : index
    %c0_21 = arith.constant 0 : index
    %21 = vector.load %arg6[%c0_20, %c0_21] : memref<16x8xf32, #tpu.memory_space<vmem>>, vector<16x8xf32>
    %22 = vector.shape_cast %21 : vector<16x8xf32> to vector<1x16x8xf32>
    %23 = vector.broadcast %22 : vector<1x16x8xf32> to vector<4x16x8xf32>
    "tpu.trace_start"() <{level = 10 : i32, message = "bhi,biw->bhw"}> : () -> ()
    %cst_22 = arith.constant dense<0.000000e+00> : vector<4x16x16xf32>
    %24 = tpu.matmul %20, %16, %cst_22 {dimension_numbers = #tpu.dot_dimension_numbers<[2], [1], [1], [2], [0, 0, 0, 1, 1, 2], [0], [0]>} : vector<4x16x8xf32>, vector<4x8x16xf32>, vector<4x16x16xf32> -> vector<4x16x16xf32>
    %cst_23 = arith.constant dense<0.000000e+00> : vector<4x16x16xf32>
    %25 = tpu.matmul %23, %17, %cst_23 {dimension_numbers = #tpu.dot_dimension_numbers<[2], [1], [1], [2], [0, 0, 0, 1, 1, 2], [0], [0]>} : vector<4x16x8xf32>, vector<4x8x16xf32>, vector<4x16x16xf32> -> vector<4x16x16xf32>
    "tpu.trace_stop"() : () -> ()
    %26 = arith.addf %24, %25 : vector<4x16x16xf32>
    %c0_24 = arith.constant 0 : index
    %c0_25 = arith.constant 0 : index
    %c0_26 = arith.constant 0 : index
    %27 = vector.load %arg9[%c0_24, %c0_25, %c0_26] : memref<4x16x16xf32, #tpu.memory_space<vmem>>, vector<4x16x16xf32>
    tpu.vector_store %arg9[%c0_24, %c0_25, %c0_26], %26 {strides = array<i32>} : memref<4x16x16xf32, #tpu.memory_space<vmem>>, vector<4x16x16xf32>,
    return
  }
  func.func @transform_0(%arg0: i32) -> (i32, i32, i32) {
    %c0_i32 = arith.constant 0 : i32
    %c0_i32_0 = arith.constant 0 : i32
    %c0_i32_1 = arith.constant 0 : i32
    return %arg0, %c0_i32, %c0_i32_0 : i32, i32, i32
  }
  func.func @transform_1(%arg0: i32) -> (i32, i32, i32) {
    %c0_i32 = arith.constant 0 : i32
    %c0_i32_0 = arith.constant 0 : i32
    %c0_i32_1 = arith.constant 0 : i32
    return %arg0, %c0_i32, %c0_i32_0 : i32, i32, i32
  }
  func.func @transform_2(%arg0: i32) -> (i32, i32, i32) {
    %c0_i32 = arith.constant 0 : i32
    %c0_i32_0 = arith.constant 0 : i32
    %c0_i32_1 = arith.constant 0 : i32
    return %arg0, %c0_i32, %c0_i32_0 : i32, i32, i32
  }
  func.func @transform_3(%arg0: i32) -> (i32, i32, i32) {
    %c0_i32 = arith.constant 0 : i32
    %c0_i32_0 = arith.constant 0 : i32
    %c0_i32_1 = arith.constant 0 : i32
    return %arg0, %c0_i32, %c0_i32_0 : i32, i32, i32
  }
  func.func @transform_4(%arg0: i32) -> (i32, i32) {
    %c0_i32 = arith.constant 0 : i32
    %c0_i32_0 = arith.constant 0 : i32
    %c0_i32_1 = arith.constant 0 : i32
    return %c0_i32, %c0_i32_0 : i32, i32
  }
  func.func @transform_5(%arg0: i32) -> (i32, i32) {
    %c0_i32 = arith.constant 0 : i32
    %c0_i32_0 = arith.constant 0 : i32
    %c0_i32_1 = arith.constant 0 : i32
    return %c0_i32, %c0_i32_0 : i32, i32
  }
  func.func @transform_6(%arg0: i32) -> (i32, i32) {
    %c0_i32 = arith.constant 0 : i32
    %c0_i32_0 = arith.constant 0 : i32
    %c0_i32_1 = arith.constant 0 : i32
    return %c0_i32, %c0_i32_0 : i32, i32
  }
  func.func @transform_7(%arg0: i32) -> (i32, i32) {
    %c0_i32 = arith.constant 0 : i32
    %c0_i32_0 = arith.constant 0 : i32
    %c0_i32_1 = arith.constant 0 : i32
    return %c0_i32, %c0_i32_0 : i32, i32
  }
  func.func @transform_8(%arg0: i32) -> (i32, i32, i32) {
    %c0_i32 = arith.constant 0 : i32
    %c0_i32_0 = arith.constant 0 : i32
    %c0_i32_1 = arith.constant 0 : i32
    return %arg0, %c0_i32, %c0_i32_0 : i32, i32, i32
  }
}

</mosaic_0001>

<bundles_post_ra>
// kernel: tpu_custom_call.1
= control target key start
LH: loop header
LB: loop body
LE: loop exit
PB: predicated region body
PF: predicated region fallthrough
CT: control target
= control target key end

     0   :  { %s2510_s0 = inlined_call_operand.hbm [shape: f32[8,8,8], index: 0, kind: input, shape index: {}]   ;;  %s2511_s1 = inlined_call_operand.hbm [shape: f32[8,8,8], index: 1, kind: input, shape index: {}]   ;;  %s2512_s2 = inlined_call_operand.hbm [shape: f32[8,8,8], index: 2, kind: input, shape index: {}]   ;;  %s2513_s3 = inlined_call_operand.hbm [shape: f32[8,8,8], index: 3, kind: input, shape index: {}]   ;;  %s2514_s4 = inlined_call_operand.vmem [shape: f32[16,8], index: 4, kind: input, shape index: {}]   ;;  %s2515_s5 = inlined_call_operand.vmem [shape: f32[16,8], index: 5, kind: input, shape index: {}]   ;;  %s2516_s6 = inlined_call_operand.vmem [shape: f32[8,16], index: 6, kind: input, shape index: {}]   ;;  %s2517_s7 = inlined_call_operand.vmem [shape: f32[8,16], index: 7, kind: input, shape index: {}]   ;;  %s2518_s8 = inlined_call_operand.hbm [shape: f32[8,16,16], index: 8, kind: output, shape index: {}]  }
   0x1   :  { %2530 = sst [smem:[#allocation20_spill]] %s2510_s0 }
   0x2   :  { %2531 = sst [smem:[#allocation21_spill]] %s2511_s1 }
   0x3   :  { %13 = vsyncpa [#allocation3], 0 }
   0x4   :  { %15 = vsyncpa [#allocation3 + $0x1], 0 }
   0x5   :  { %16 = vsyncpa [#allocation6], 0 }
   0x6   :  { %18 = vsyncpa [#allocation6 + $0x1], 0 }
   0x7   :  { %19 = vsyncpa [#allocation9], 0 }
   0x8   :  { %21 = vsyncpa [#allocation9 + $0x1], 0 }
   0x9   :  { %22 = vsyncpa [#allocation4], 0 }
   0xa   :  { %24 = vsyncpa [#allocation4 + $0x1], 0  ;;  %s2144_s27 = smov 0   ;;  %s2146_s28 = smov 0  }
   0xb   :  { %s2148_s29 = smov 0   ;;  %s2150_s30 = smov 0  }
   0xc LB: > { %2532 = sst [smem:[#allocation15_spill]] %s2084_s29  ;;  %s2165_s9 = sadd.s32 4294967295, %s2088_s30   ;;  %s2088_s30 = sphi %s2150_s30, %s2555_s30   ;;  %s2084_s29 = sphi %s2148_s29, %s2557_s29   ;;  %s2080_s28 = sphi %s2146_s28, %s2559_s28   ;;  %s2076_s27 = sphi %s2144_s27, %s2558_s27  }
   0xd   : > { %2533 = sst [smem:[#allocation16_spill]] %s2088_s30  ;;  %s1632_s10 = sadd.s32 4294967294, %s2088_s30  }
   0xe   : > { %s2169_s11 = sadd.s32 1, %s2088_s30   ;;  %s37_s12 = sadd.s32 1, %s2084_s29 }
   0xf   : > { %2534 = sst [smem:[#allocation17_spill]] %s2169_s11  ;;  %s34_s13 = ssub.s32 %s2088_s30, %s2169_s11 }
  0x10   : > { %p44_p0 = scmp.ne.s32.totalorder %s2084_s29, %s2080_s28  ;;  %p35_p1 = scmp.eq.s32.totalorder %s34_s13, 0 }
  0x11   : > { %p45_p2 = scmp.eq.s32.totalorder %s2088_s30, 0  ;;  %p50_p3 = scmp.ne.s32.totalorder %s2080_s28, %s2076_s27 }
  0x12   : > { %p51_p4 = scmp.eq.s32.totalorder %s2165_s9, 0  ;;  %p236_p7 = scmp.eq.s32.totalorder %s2165_s9, 1 }
  0x13   : > { %s2181_s14 = scalar_select %p35_p1, %s2084_s29, %s37_s12  }
  0x14   : > { %p46_p5 = por %p45_p2, %p44_p0  ;;  %p2183_p6 = por %p51_p4, %p50_p3 }
  0x15   : > { %2535 = sst [smem:[#allocation18_spill]] %s2181_s14  ;;  %p242_p8 = scmp.eq.s32.totalorder %s1632_s10, 1 }
  0x16   : > { %s2536_s15 = scalar_select %p2183_p6, 1, 0 }
  0x17   : > { %p1856_p10 = scmp.lt.s32.totalorder %s2088_s30, 2  ;;  %p2190_p11 = por %p236_p7, %p44_p0 }
  0x18   : > { %p2194_p12 = por %p242_p8, %p50_p3  ;;  %s2199_s18 = sand.u32 1, %s2084_s29  }
  0x19   : > { %s2537_s16 = scalar_select %p2190_p11, 1, 0 }
  0x1a   : > { %s2538_s17 = scalar_select %p2194_p12, 1, 0 }
  0x1b   : > { %s2202_s19 = sshll.u32 %s2088_s30, 9  ;;  %s2205_s20 = sshll.u32 %s2199_s18, 5 }
  0x1c   : > { %2539 = sst [smem:[#allocation19_spill]] %s2538_s17  ;;  %p2207_p13 = pnand %p1856_p10, %p46_p5 }
  0x1d   : > { %s295_s22 = sand.u32 1, %s2088_s30   ;;  %s2541_s1 = sld [smem:[#allocation21_spill]] }
  0x1e   : > { %s299_s26 = scalar_lea.vmem [#allocation5], %s2205_s20  ;;  %s2222_s12 = scalar_lea.sflag [#allocation6], %s295_s22 }
  0x1f   : > { %s306_s10 = sshll.u32 %s299_s26, 4  ;;  %p2228_p2 = pneg %p2207_p13  ;;  %s2219_s10 = int_to_ptr.vmem [resolvable:$true] %s306_s10 }
  0x23   : > { %s2216_s25 = scalar_lea.hbm %s2541_s1, %s2202_s19  ;;  %s1899_s26 = scalar_lea.hbm %s2541_s1, 1024 }
  0x24   : > { %s1894_s13 = scalar_lea.hbm %s2216_s25, 512  ;;  %p1900_p5 = scmp.lt.u32.totalorder %s2216_s25, %s2541_s1 }
  0x25   : > { %p1895_p1 = scmp.ne.s32.totalorder %s2216_s25, %s1894_s13  ;;  %p1901_p7 = scmp.lt.u32.totalorder %s1899_s26, %s1894_s13 }
  0x26   : > { %p1903_p10 = scmp.lt.u32.totalorder %s1894_s13, %s2216_s25 }
  0x27   : > { %p1897_p3 = pnand %p2228_p2, %p1895_p1  ;;  %p1902_p8 = por %p1901_p7, %p1900_p5 }
  0x29   : > { %p1898_p4 = pneg %p1897_p3  ;;  %p1904_p9 = por %p1903_p10, %p1902_p8 }
  0x2b   : > { %p1905_p0 = pnand %p1904_p9, %p1898_p4 }
  0x2d   : > { %1908 = shalt.err (!%p1905_p0)
}
  0x2e   : > { %s1909_s22 = scalar_lea.vmem %s2219_s10, 512  ;;  %s2090_s23 = smov [#allocation5]  }
  0x2f   : > { %p1910_p1 = scmp.ne.s32.totalorder %s2219_s10, %s1909_s22  ;;  %s1914_s24 = sshll.u32 %s2090_s23, 4  ;;  %s1915_s24 = int_to_ptr.vmem [resolvable:$false] %s1914_s24 }
  0x30   : > { %s1916_s29 = scalar_lea.vmem %s1915_s24, 1024  ;;  %p1917_p11 = scmp.lt.s32.totalorder %s2219_s10, %s1915_s24 }
  0x31   : > { %p1912_p3 = pnand %p1910_p1, %p2228_p2  ;;  %p1918_p6 = scmp.lt.s32.totalorder %s1916_s29, %s1909_s22 }
  0x33   : > { %p1913_p12 = pneg %p1912_p3  ;;  %p1919_p5 = por %p1918_p6, %p1917_p11 }
  0x35   : > { %p1920_p7 = pnand %p1919_p5, %p1913_p12 }
  0x37   : > { %1923 = shalt.err (!%p1920_p7)
}
  0x38   : > { %s2524_s11 = smov 128   ;;  %s2526_s13 = smov 8  }
  0x39   : > { %1845 = dma.hbm_to_vmem [thread:$0]  (!%p2207_p13), %s2216_s25, 512, %s2219_s10, %s2222_s12, %s2524_s11, %s2524_s11, %s2526_s13  }
  0x3a   : > { %p356_p6 = scmp.lt.s32.totalorder %s2088_s30, 3  ;;  %s2543_s0 = sld [smem:[#allocation20_spill]] }
  0x3b   : > { %p2544_p9 = scmp.ge.s32.totalorder %s2088_s30, 1  ;;  %s278_s29 = scalar_lea.vmem [#allocation2], %s2205_s20 }
  0x3c   : > { %s285_s1 = sshll.u32 %s278_s29, 4  ;;  %s275_s25 = scalar_lea.sflag [#allocation3], %s2199_s18  ;;  %s2269_s1 = int_to_ptr.vmem [resolvable:$true] %s285_s1 }
  0x3d   : > { %p2264_p11 = pnand %p2544_p9, %p356_p6 }
  0x3f   : > { %s2545_s24 = scalar_select %p2264_p11, 1, 0 }
  0x40   : > { %s2260_s23 = scalar_lea.hbm %s2543_s0, %s2202_s19  ;;  %s1929_s11 = scalar_lea.hbm %s2543_s0, 1024 }
  0x41   : > { %s1924_s10 = scalar_lea.hbm %s2260_s23, 512  ;;  %p1930_p8 = scmp.lt.u32.totalorder %s2260_s23, %s2543_s0 }
  0x42   : > { %p1925_p12 = scmp.ne.s32.totalorder %s2260_s23, %s1924_s10  ;;  %p1931_p10 = scmp.lt.u32.totalorder %s1929_s11, %s1924_s10 }
  0x43   : > { %p1933_p3 = scmp.lt.u32.totalorder %s1924_s10, %s2260_s23 }
  0x44   : > { %p1927_p0 = pnand %p1925_p12, %p2228_p2  ;;  %p1932_p1 = por %p1931_p10, %p1930_p8 }
  0x46   : > { %p1928_p4 = pneg %p1927_p0  ;;  %p1934_p5 = por %p1933_p3, %p1932_p1 }
  0x48   : > { %p1935_p7 = pnand %p1934_p5, %p1928_p4 }
  0x4a   : > { %1938 = shalt.err (!%p1935_p7)
}
  0x4b   : > { %s1939_s29 = scalar_lea.vmem %s2269_s1, 512  ;;  %s2093_s26 = smov [#allocation2]  }
  0x4c   : > { %p1940_p6 = scmp.ne.s32.totalorder %s2269_s1, %s1939_s29  ;;  %s1944_s22 = sshll.u32 %s2093_s26, 4  ;;  %s1945_s22 = int_to_ptr.vmem [resolvable:$false] %s1944_s22 }
  0x4d   : > { %s1946_s30 = scalar_lea.vmem %s1945_s22, 1024  ;;  %p1947_p0 = scmp.lt.s32.totalorder %s2269_s1, %s1945_s22 }
  0x4e   : > { %p1942_p9 = pnand %p1940_p6, %p2228_p2  ;;  %p1948_p11 = scmp.lt.s32.totalorder %s1946_s30, %s1939_s29 }
  0x50   : > { %p1943_p12 = pneg %p1942_p9  ;;  %p1949_p8 = por %p1948_p11, %p1947_p0 }
  0x52   : > { %p1950_p10 = pnand %p1949_p8, %p1943_p12 }
  0x54   : > { %1953 = shalt.err (!%p1950_p10)
}
  0x55   : > { %s2546_s11 = smov 8   ;;  %s2547_s13 = smov 128  }
  0x56   : > { %1842 = dma.hbm_to_vmem [thread:$0]  (!%p2207_p13), %s2260_s23, 512, %s2269_s1, %s275_s25, %s2547_s13, %s2547_s13, %s2546_s11  }
  0x57   : > { %s2302_s29 = scalar_lea.hbm %s2512_s2, %s2202_s19  ;;  %s320_s22 = scalar_lea.vmem [#allocation7], %s2205_s20 }
  0x58   : > { %s327_s30 = sshll.u32 %s320_s22, 4  ;;  %s1954_s0 = scalar_lea.hbm %s2302_s29, 512  ;;  %s2305_s30 = int_to_ptr.vmem [resolvable:$true] %s327_s30 }
  0x59   : > { %p1955_p11 = scmp.ne.s32.totalorder %s2302_s29, %s1954_s0  ;;  %s1959_s23 = scalar_lea.hbm %s2512_s2, 1024 }
  0x5a   : > { %p1960_p3 = scmp.lt.u32.totalorder %s2302_s29, %s2512_s2  ;;  %p1961_p5 = scmp.lt.u32.totalorder %s1959_s23, %s1954_s0 }
  0x5b   : > { %p1957_p4 = pnand %p1955_p11, %p2228_p2  ;;  %p1963_p6 = scmp.lt.u32.totalorder %s1954_s0, %s2302_s29 }
  0x5c   : > { %p1962_p7 = por %p1961_p5, %p1960_p3 }
  0x5d   : > { %p1958_p1 = pneg %p1957_p4 }
  0x5e   : > { %p1964_p9 = por %p1963_p6, %p1962_p7 }
  0x60   : > { %p1965_p12 = pnand %p1964_p9, %p1958_p1 }
  0x62   : > { %1968 = shalt.err (!%p1965_p12)
}
  0x63   : > { %s1969_s26 = scalar_lea.vmem %s2305_s30, 512  ;;  %s2094_s17 = smov [#allocation7]  }
  0x64   : > { %p1970_p0 = scmp.ne.s32.totalorder %s2305_s30, %s1969_s26  ;;  %s1974_s22 = sshll.u32 %s2094_s17, 4  ;;  %s1975_s22 = int_to_ptr.vmem [resolvable:$false] %s1974_s22 }
  0x65   : > { %s1976_s1 = scalar_lea.vmem %s1975_s22, 1024  ;;  %p1977_p11 = scmp.lt.s32.totalorder %s2305_s30, %s1975_s22 }
  0x66   : > { %p1972_p8 = pnand %p1970_p0, %p2228_p2  ;;  %p1978_p4 = scmp.lt.s32.totalorder %s1976_s1, %s1969_s26 }
  0x68   : > { %p1973_p10 = pneg %p1972_p8  ;;  %p1979_p3 = por %p1978_p4, %p1977_p11 }
  0x6a   : > { %p1980_p5 = pnand %p1979_p3, %p1973_p10 }
  0x6c   : > { %1983 = shalt.err (!%p1980_p5)
}
  0x6d   : > { %1848 = dma.hbm_to_vmem [thread:$0]  (!%p2207_p13), %s2302_s29, 512, %s2305_s30, %s2222_s12, %s2547_s13, %s2547_s13, %s2546_s11  }
  0x6e   : > { %s2336_s25 = scalar_lea.hbm %s2513_s3, %s2202_s19  ;;  %s341_s10 = scalar_lea.vmem [#allocation8], %s2205_s20 }
  0x6f   : > { %s348_s26 = sshll.u32 %s341_s10, 4  ;;  %s338_s17 = scalar_lea.sflag [#allocation9], %s2199_s18  ;;  %s2339_s26 = int_to_ptr.vmem [resolvable:$true] %s348_s26 }
  0x70   : > { %s1984_s22 = scalar_lea.hbm %s2336_s25, 512  ;;  %s1989_s30 = scalar_lea.hbm %s2513_s3, 1024 }
  0x71   : > { %p1985_p1 = scmp.ne.s32.totalorder %s2336_s25, %s1984_s22  ;;  %p1990_p9 = scmp.lt.u32.totalorder %s2336_s25, %s2513_s3 }
  0x72   : > { %p1991_p12 = scmp.lt.u32.totalorder %s1989_s30, %s1984_s22  ;;  %p1993_p8 = scmp.lt.u32.totalorder %s1984_s22, %s2336_s25 }
  0x73   : > { %p1987_p7 = pnand %p1985_p1, %p2228_p2 }
  0x74   : > { %p1992_p0 = por %p1991_p12, %p1990_p9 }
  0x75   : > { %p1988_p6 = pneg %p1987_p7 }
  0x76   : > { %p1994_p10 = por %p1993_p8, %p1992_p0 }
  0x78   : > { %p1995_p11 = pnand %p1994_p10, %p1988_p6 }
  0x7a   : > { %1998 = shalt.err (!%p1995_p11)
}
  0x7b   : > { %s1999_s20 = scalar_lea.vmem %s2339_s26, 512  ;;  %s2095_s0 = smov [#allocation8]  }
  0x7c   : > { %p2000_p4 = scmp.ne.s32.totalorder %s2339_s26, %s1999_s20  ;;  %s2004_s23 = sshll.u32 %s2095_s0, 4  ;;  %s2005_s23 = int_to_ptr.vmem [resolvable:$false] %s2004_s23 }
  0x7d   : > { %s2006_s10 = scalar_lea.vmem %s2005_s23, 1024  ;;  %p2007_p1 = scmp.lt.s32.totalorder %s2339_s26, %s2005_s23 }
  0x7e   : > { %p2002_p3 = pnand %p2000_p4, %p2228_p2  ;;  %p2008_p7 = scmp.lt.s32.totalorder %s2006_s10, %s1999_s20 }
  0x80   : > { %p2003_p5 = pneg %p2002_p3  ;;  %p2009_p9 = por %p2008_p7, %p2007_p1 }
  0x82   : > { %p2010_p12 = pnand %p2009_p9, %p2003_p5 }
  0x84   : > { %2013 = shalt.err (!%p2010_p12)
}
  0x85   : > { %1851 = dma.hbm_to_vmem [thread:$0]  (!%p2207_p13), %s2336_s25, 512, %s2339_s26, %s338_s17, %s2547_s13, %s2547_s13, %s2546_s11  }
  0x86   : > { %p2548_p2 = scmp.ne.s32.totalorder %s2545_s24, 0 }
  0x87   : > { %s2371_s14 = sand.u32 (!%p2548_p2), 1, %s2080_s28   ;;  %p2549_p6 = scmp.ne.s32.totalorder (!%p2548_p2), %s2536_s15, 0 }
  0x88   : > { %360 = sbr.rel (%p2548_p2) target bundleno = 617 (0x269), region = 52  ;;  %s1648_s22 = sshll.u32 (!%p2548_p2), %s2371_s14, 5 }
  0x89   : > { %s363_s12 = scalar_lea.sflag (!%p2548_p2), [#allocation3], %s2371_s14  ;;  %s2375_s21 = scalar_lea.vmem (!%p2548_p2), [#allocation2], %s1648_s22 }
  0x8f   : > { %2059 = dma.done.wait (%p2549_p6), %s363_s12, 512  }
  0x90   : > { %2061 = vsyncadd (%p2549_p6), %s363_s12, 4294966784  ;;  %s371_s18 = sand.u32 1, %s2165_s9   ;;  %s375_s11 = scalar_lea.vmem [#allocation5], %s1648_s22 }
  0x91   : > { %s372_s24 = scalar_lea.sflag [#allocation6], %s371_s18 }
  0x92   : > { %2063 = dma.done.wait (%p2549_p6), %s372_s24, 1024  }
  0x93   : > { %2065 = vsyncadd (%p2549_p6), %s372_s24, 4294966272  ;;  %s2386_s13 = scalar_lea.vmem [#allocation7], %s1648_s22  ;;  %s390_s25 = scalar_lea.sflag [#allocation9], %s2371_s14 }
  0x94   : > { %s393_s26 = scalar_lea.vmem [#allocation8], %s1648_s22 }
  0x95   : > { %2067 = dma.done.wait (%p2549_p6), %s390_s25, 512  }
  0x96   : > { %2069 = vsyncadd (%p2549_p6), %s390_s25, 4294966784  ;;  %vm464_vm0 = vcmask 64512   ;;  %v463_v0 = vld [vmem:[%s2517_s7] sm:$0xff]  ;;  %v459_v2 = vld [vmem:[%s393_s26 + $0x8] sm:$0xff]  ;;  %vm1469_vm1 = vcmask 130048   ;;  %p2550_p0 = scmp.ne.s32.totalorder %s2537_s16, 0 }
  0x97   : > { %v458_v1 = vld [vmem:[%s393_s26] sm:$0xff]  ;;  %1757 = vmatprep.subr.mxu1 %v463_v0  ;;  %v460_v4 = vld [vmem:[%s393_s26 + $0x10] sm:$0xff]  ;;  %1741 = vmatprep.subr.mxu0 %v463_v0  ;;  %v451_v5 = vld [vmem:[%s375_s11 + $0x8] sm:$0xff]  ;;  %s2096_s29 = smov [#allocation10]  }
  0x98   : > { %1759 = vmatprep.mubr.msk.f32.mxu1 %vm464_vm0, %v458_v1  ;;  %v450_v3 = vld [vmem:[%s375_s11] sm:$0xff]  ;;  %1758 = vmatpush3.msra.mxu1 %v463_v0  ;;  %v452_v7 = vld [vmem:[%s375_s11 + $0x10] sm:$0xff]  ;;  %v461_v8 = vld [vmem:[%s393_s26 + $0x18] sm:$0xff]  ;;  %s2018_s30 = sshll.u32 %s2096_s29, 4  ;;  %s2019_s30 = int_to_ptr.vmem [resolvable:$false] %s2018_s30 }
  0x99   : > { %v462_v6 = vld [vmem:[%s2516_s6] sm:$0xff]  ;;  %1760 = vmatmul.mubr.msk.f32.vlgmr.msra.gmra.mrb[0].mxu1 %vm464_vm0, %v459_v2  ;;  %1742 = vmatpush3.msra.mxu0 %v463_v0  ;;  %v453_v10 = vld [vmem:[%s375_s11 + $0x18] sm:$0xff]  ;;  %v455_v12 = vld [vmem:[%s2386_s13 + $0x8] sm:$0xff]  ;;  %s1696_s11 = sshll.u32 %s2165_s9, 10  ;;  %s1479_s9 = scalar_lea.sflag [#allocation4], %s2371_s14 }
  0x9a   : > { %1743 = vmatprep.mubr.msk.f32.mxu0 %vm464_vm0, %v450_v3  ;;  %1762 = vmatprep.mubr.msk.f32.mxu1 %vm464_vm0, %v460_v4  ;;  %v454_v9 = vld [vmem:[%s2386_s13] sm:$0xff]  ;;  %v456_v13 = vld [vmem:[%s2386_s13 + $0x10] sm:$0xff]  ;;  %v447_v14 = vld [vmem:[%s2375_s21 + $0x8] sm:$0xff]  ;;  %s2462_s26 = scalar_lea.hbm %s2518_s8, %s1696_s11  ;;  %s2020_s19 = scalar_lea.vmem %s2019_s30, 2048 }
  0x9b   : > { %1744 = vmatmul.mubr.msk.f32.vlgmr.msra.gmra.mrb[0].mxu0 %vm464_vm0, %v451_v5  ;;  %1765 = vmatprep.subr.mxu1 %v462_v6  ;;  %v446_v11 = vld [vmem:[%s2375_s21] sm:$0xff]  ;;  %v448_v15 = vld [vmem:[%s2375_s21 + $0x10] sm:$0xff]  ;;  %v457_v16 = vld [vmem:[%s2386_s13 + $0x18] sm:$0xff] }
  0x9c   : > { %1746 = vmatprep.mubr.msk.f32.mxu0 %vm464_vm0, %v452_v7  ;;  %1766 = vmatpush3.msra.mxu1 %v462_v6  ;;  %v449_v17 = vld [vmem:[%s2375_s21 + $0x18] sm:$0xff]  ;;  %v855_v18 = vld [vmem:[%s2515_s5] sm:$0xff]  ;;  %v856_v20 = vld [vmem:[%s2515_s5 + $0x8] sm:$0xff]  ;;  %s1652_s21 = sshll.u32 %s2371_s14, 6 }
  0x9d   : > { %1763 = vmatmul.mubr.msk.f32.gmra.mrb[2].mxu1 %vm464_vm0, %v461_v8  ;;  %1749 = vmatprep.subr.mxu0 %v462_v6  ;;  %v853_v28 = vld [vmem:[%s2514_s4] sm:$0xff]  ;;  %v854_v29 = vld [vmem:[%s2514_s4 + $0x8] sm:$0xff]  ;;  %s440_s18 = scalar_lea.vmem [#allocation10], %s1652_s21 }
  0x9e   : > { %1767 = vmatprep.mubr.msk.f32.mxu1 %vm464_vm0, %v454_v9  ;;  %1750 = vmatpush3.msra.mxu0 %v462_v6  ;;  %s1493_s24 = sshll.u32 %s440_s18, 4  ;;  %s2456_s24 = int_to_ptr.vmem [resolvable:$true] %s1493_s24 }
  0x9f   : > { %1747 = vmatmul.mubr.msk.f32.gmra.mrb[2].mxu0 %vm464_vm0, %v453_v10  ;;  %s2014_s17 = scalar_lea.vmem %s2456_s24, 1024  ;;  %p2021_p11 = scmp.lt.s32.totalorder %s2456_s24, %s2019_s30 }
  0xa0   : > { %1751 = vmatprep.mubr.msk.f32.mxu0 %vm464_vm0, %v446_v11  ;;  %p2015_p13 = scmp.ne.s32.totalorder %s2456_s24, %s2014_s17  ;;  %p2022_p4 = scmp.lt.s32.totalorder %s2020_s19, %s2014_s17 }
  0xa1   : > { %1768 = vmatmul.mubr.msk.f32.vlgmr.msra.gmra.mrb[0].mxu1 %vm464_vm0, %v455_v12 }
  0xa2   : > { %1770 = vmatprep.mubr.msk.f32.mxu1 %vm464_vm0, %v456_v13  ;;  %p2016_p8 = pnand %p2015_p13, %p2550_p0  ;;  %p2023_p3 = por %p2022_p4, %p2021_p11 }
  0xa3   : > { %1752 = vmatmul.mubr.msk.f32.vlgmr.msra.gmra.mrb[0].mxu0 %vm464_vm0, %v447_v14 }
  0xa4   : > { %1754 = vmatprep.mubr.msk.f32.mxu0 %vm464_vm0, %v448_v15  ;;  %p2017_p10 = pneg %p2016_p8 }
  0xa5   : > { %1771 = vmatmul.mubr.msk.f32.gmra.mrb[2].mxu1 %vm464_vm0, %v457_v16 }
  0xa6   : > { %1780 = vmatprep.mubr.msk.f32.mxu1 %vm464_vm0, %v855_v18  ;;  %p2024_p5 = pnand %p2023_p3, %p2017_p10 }
  0xa7   : > { %1755 = vmatmul.mubr.msk.f32.gmra.mrb[2].mxu0 %vm464_vm0, %v449_v17 }
  0xa8   : > { %1775 = vmatprep.mubr.msk.f32.mxu0 %vm464_vm0, %v855_v18 }
 0x174   : > { %v1769_v19 = vpop.f32.mrb[0].mxu1 }
 0x175   : > { %v834_v21 = vpop.f32.mrb[1].mxu1  ;;  %1778 = vmatprep.subr.mxu1 %v1769_v19 }
 0x176   : > { %1773 = vmatprep.subr.mxu0 %v834_v21  ;;  %1779 = vmatpush3.msra.mxu1 %v1769_v19  ;;  %v1753_v22 = vpop.f32.mrb[0].mxu0 }
 0x177   : > { %1774 = vmatpush3.msra.mxu0 %v834_v21  ;;  %1781 = vmatmul.mubr.msk.f32.vlgmr.msra.gmra.mrb[4].mxu1 %vm464_vm0, %v856_v20  ;;  %v640_v23 = vpop.f32.mrb[1].mxu0 }
 0x178   : > { %v1772_v24 = vpop.f32.mrb[2].mxu1  ;;  %1776 = vmatmul.mubr.msk.f32.vlgmr.msra.gmra.mrb[4].mxu0 %vm464_vm0, %v856_v20  ;;  %1790 = vmatprep.mubr.msk.f32.mxu1 %vm464_vm0, %v855_v18 }
 0x179   : > { %v844_v25 = vpop.f32.mrb[3].mxu1  ;;  %1788 = vmatprep.subr.mxu1 %v1772_v24  ;;  %1785 = vmatprep.mubr.msk.f32.mxu0 %vm464_vm0, %v855_v18 }
 0x17a   : > { %1783 = vmatprep.subr.mxu0 %v844_v25  ;;  %1789 = vmatpush3.msra.mxu1 %v1772_v24  ;;  %v1756_v26 = vpop.f32.mrb[2].mxu0 }
 0x17b   : > { %1784 = vmatpush3.msra.mxu0 %v844_v25  ;;  %1791 = vmatmul.mubr.msk.f32.vlgmr.msra.gmra.mrb[6].mxu1 %vm464_vm0, %v856_v20  ;;  %v650_v27 = vpop.f32.mrb[3].mxu0 }
 0x17c   : > { %1798 = vmatprep.subr.mxu1 %v1753_v22  ;;  %1786 = vmatmul.mubr.msk.f32.vlgmr.msra.gmra.mrb[6].mxu0 %vm464_vm0, %v856_v20 }
 0x17d   : > { %1793 = vmatprep.subr.mxu0 %v640_v23  ;;  %1799 = vmatpush3.msra.mxu1 %v1753_v22 }
 0x17e   : > { %1794 = vmatpush3.msra.mxu0 %v640_v23  ;;  %1808 = vmatprep.subr.mxu1 %v1756_v26 }
 0x17f   : > { %1800 = vmatprep.mubr.msk.f32.mxu1 %vm464_vm0, %v853_v28  ;;  %1803 = vmatprep.subr.mxu0 %v650_v27 }
 0x180   : > { %1795 = vmatprep.mubr.msk.f32.mxu0 %vm464_vm0, %v853_v28  ;;  %1801 = vmatmul.mubr.msk.f32.vlgmr.msra.gmra.mrb[4].mxu1 %vm464_vm0, %v854_v29 }
 0x181   : > { %1809 = vmatpush3.msra.mxu1 %v1756_v26  ;;  %1796 = vmatmul.mubr.msk.f32.vlgmr.msra.gmra.mrb[4].mxu0 %vm464_vm0, %v854_v29 }
 0x182   : > { %1804 = vmatpush3.msra.mxu0 %v650_v27  ;;  %1810 = vmatprep.mubr.msk.f32.mxu1 %vm464_vm0, %v853_v28 }
 0x183   : > { %1805 = vmatprep.mubr.msk.f32.mxu0 %vm464_vm0, %v853_v28 }
 0x184   : > { %1811 = vmatmul.mubr.msk.f32.vlgmr.msra.gmra.mrb[6].mxu1 %vm464_vm0, %v854_v29 }
 0x185   : > { %1806 = vmatmul.mubr.msk.f32.vlgmr.msra.gmra.mrb[6].mxu0 %vm464_vm0, %v854_v29 }
 0x253   : > { %v1802_v30 = vpop.f32.mrb[4].mxu1 }
 0x254   : > { %1473 = vst.msk [vmem:[%s440_s18 + $0x18] sm:$0xff] %vm1469_vm1, %v1802_v30  ;;  %v1797_v31 = vpop.f32.mrb[4].mxu0  ;;  %v1310_v32 = vpop.f32.mrb[5].mxu1 }
 0x255   : > { %1471 = vst.msk [vmem:[%s440_s18 + $0x8] sm:$0xff] %vm1469_vm1, %v1797_v31  ;;  %1472 = vst.msk [vmem:[%s440_s18 + $0x10] sm:$0xff] %vm1469_vm1, %v1310_v32  ;;  %v1235_v33 = vpop.f32.mrb[5].mxu0 }
 0x256   : > { %1470 = vst.msk [vmem:[%s440_s18] sm:$0xff] %vm1469_vm1, %v1235_v33 }
 0x257   : > { %v1812_v34 = vpop.f32.mrb[6].mxu1 }
 0x258   : > { %1477 = vst.msk [vmem:[%s440_s18 + $0x38] sm:$0xff] %vm1469_vm1, %v1812_v34  ;;  %v1807_v35 = vpop.f32.mrb[6].mxu0  ;;  %v1460_v36 = vpop.f32.mrb[7].mxu1 }
 0x259   : > { %1475 = vst.msk [vmem:[%s440_s18 + $0x28] sm:$0xff] %vm1469_vm1, %v1807_v35  ;;  %1476 = vst.msk [vmem:[%s440_s18 + $0x30] sm:$0xff] %vm1469_vm1, %v1460_v36  ;;  %v1385_v37 = vpop.f32.mrb[7].mxu0 }
 0x25a   : > { %1474 = vst.msk [vmem:[%s440_s18 + $0x20] sm:$0xff] %vm1469_vm1, %v1385_v37 }
 0x25b   : > { %2027 = shalt.err (!%p2024_p5)
}
 0x25c   : > { %s2028_s15 = scalar_lea.hbm %s2462_s26, 1024  ;;  %s2032_s0 = scalar_lea.hbm %s2518_s8, 2048 }
 0x25d   : > { %p2029_p1 = scmp.ne.s32.totalorder %s2462_s26, %s2028_s15  ;;  %p2033_p12 = scmp.lt.u32.totalorder %s2462_s26, %s2518_s8 }
 0x25e   : > { %p2034_p2 = scmp.lt.u32.totalorder %s2032_s0, %s2028_s15  ;;  %p2036_p13 = scmp.lt.u32.totalorder %s2028_s15, %s2462_s26 }
 0x25f   : > { %p2030_p7 = pnand %p2029_p1, %p2550_p0 }
 0x260   : > { %p2035_p6 = por %p2034_p2, %p2033_p12 }
 0x261   : > { %p2031_p9 = pneg %p2030_p7 }
 0x262   : > { %p2037_p8 = por %p2036_p13, %p2035_p6 }
 0x264   : > { %p2038_p10 = pnand %p2037_p8, %p2031_p9 }
 0x266   : > { %2041 = shalt.err (!%p2038_p10)
}
 0x267   : > { %s2097_s22 = smov 128   ;;  %s2098_s12 = smov 8  }
 0x268   : > { %1837 = dma.vmem_to_hbm [thread:$0]  (%p2550_p0), %s2456_s24, 1024, %s2462_s26, %s1479_s9, %s2097_s22, %s2097_s22, %s2098_s12  }
 0x269 PF: > { %s2551_s21 = sld [smem:[#allocation19_spill]]  ;;  %s2552_s18 = sld [smem:[#allocation16_spill]] }
 0x26a   : > { %s1508_s11 = sand.u32 1, %s2076_s27  }
 0x26b   : > { %s1509_s13 = scalar_lea.sflag [#allocation4], %s1508_s11 }
 0x26f   : > { %p2553_p11 = scmp.ne.s32.totalorder %s2551_s21, 0  ;;  %p2554_p4 = scmp.ge.s32.totalorder %s2552_s18, 2 }
 0x271   : > { %p1853_p3 = pnand %p2554_p4, %p2553_p11 }
 0x273   : > { %2071 = dma.done.wait (!%p1853_p3), %s1509_s13, 1024  }
 0x274   : > { %2073 = vsyncadd (!%p1853_p3), %s1509_s13, 4294966272  ;;  %s2555_s30 = sld [smem:[#allocation17_spill]]  ;;  %s2556_s25 = sld [smem:[#allocation15_spill]] }
 0x275   : > { %s2557_s29 = sld [smem:[#allocation18_spill]]  ;;  %s2558_s27 = smov %s2080_s28 }
 0x27a   : > { %p27_p5 = scmp.ge.s32.totalorder %s2555_s30, 4   ;;  %s2559_s28 = smov %s2556_s25 }
 0x27c   :  { %29 = sbr.rel (!%p27_p5) target bundleno = 12 (0xc), region = 134 }
 0x283   :  { %1514 = vsyncpa [#allocation3], 1 }
 0x284   :  { %1516 = vsyncpa [#allocation3 + $0x1], 1 }
 0x285   :  { %1517 = vsyncpa [#allocation6], 1 }
 0x286   :  { %1519 = vsyncpa [#allocation6 + $0x1], 1 }
 0x287   :  { %1520 = vsyncpa [#allocation9], 1 }
 0x288   :  { %1522 = vsyncpa [#allocation9 + $0x1], 1 }
 0x289   :  { %1523 = vsyncpa [#allocation4], 1 }
 0x28a   :  { %1525 = vsyncpa [#allocation4 + $0x1], 1 }

</bundles_post_ra>
